<compile_context>
chip_gen: v6e
topology: v6e:2x2x1
jax: 0.10.0
libtpu: 0.0.40
codegen_flags: <defaults>
</compile_context>

<pallas_src>
import jax
import jax.numpy as jnp
from jax.experimental import pallas as pl
from jax.experimental.pallas import tpu as pltpu


# -----------------------------------------------------------------------------
# Pallas kernel: 2-layer GCN (GCNConv -> ReLU -> GCNConv) + tanh, transposed
# lane-dense layout over all M = T*N rows at once.
#   adjT : (M, M)    block-diagonal A_blk^T = kron(I_T, A_hat^T)
#   xT   : (F_in, M)
#   w1T  : (H, F_in),   b1 : (H, 1)
#   w2T  : (F_out, H),  b2 : (F_out, 1)
#   out  : (F_out, M)   -- already the lane-dense slab the wrapper wants
# -----------------------------------------------------------------------------
def stgi_spatial_kernel(adjT_ref, xT_ref, w1T_ref, b1_ref, w2T_ref, b2_ref,
                        o_ref):
    adjT = adjT_ref[...]                                   # (M, M)

    # ---- Layer 1: h^T = ReLU(W1^T (X^T A^T) + b1)  ==  ReLU(((A X) W1)^T + b1)
    axT = jnp.dot(xT_ref[...], adjT,
                  preferred_element_type=jnp.float32)      # (F_in, M)
    hT = jnp.maximum(
        jnp.dot(w1T_ref[...], axT,
                preferred_element_type=jnp.float32) + b1_ref[...],
        0.0)                                               # (H, M)

    # ---- Layer 2: out^T = tanh((W2^T H^T) A^T + b2)  ==  tanh((A (H W2))^T + b2)
    hwT = jnp.dot(w2T_ref[...], hT,
                  preferred_element_type=jnp.float32)      # (F_out, M)
    o_ref[...] = jnp.tanh(
        jnp.dot(hwT, adjT, preferred_element_type=jnp.float32) + b2_ref[...])


# -----------------------------------------------------------------------------
# Wrapper
# -----------------------------------------------------------------------------
def build_stgi_operands(adj_hat, w1, b1, w2, b2, time_steps):
    """Static-graph / static-parameter preprocessing.

    For a fixed graph + fixed weights this is pure glue and should be hoisted
    out of the per-call hot path (compute once, reuse across forwards).
    """
    eye_t = jnp.eye(time_steps, dtype=adj_hat.dtype)
    adjT_blk = jnp.kron(eye_t, adj_hat.T)                 # (T*N, T*N) = A_blk^T
    return (adjT_blk, w1.T, b1.reshape(-1, 1), w2.T, b2.reshape(-1, 1))


def stgi_forward(x, mask, adjT_blk, w1T, b1c, w2T, b2c):
    """x: (T, N, F_in) f32.  Returns (imputed_x (T, N, F_out), temporal_graph_time)."""
    del mask  # unused in the default (spatial-only) STGI configuration
    T, N, F_in = x.shape
    M = T * N
    F_out = w2T.shape[0]
    assert adjT_blk.shape == (M, M)

    # Layout plumbing only: present the kernel with a lane-dense (F_in, M) slab.
    xT = x.reshape(M, F_in).T

    vmem = pltpu.MemorySpace.VMEM
    outT = pl.pallas_call(
        stgi_spatial_kernel,
        out_shape=jax.ShapeDtypeStruct((F_out, M), jnp.float32),
        in_specs=[
            pl.BlockSpec(memory_space=vmem),   # adjT_blk (M, M)
            pl.BlockSpec(memory_space=vmem),   # xT       (F_in, M)
            pl.BlockSpec(memory_space=vmem),   # w1T      (H, F_in)
            pl.BlockSpec(memory_space=vmem),   # b1       (H, 1)
            pl.BlockSpec(memory_space=vmem),   # w2T      (F_out, H)
            pl.BlockSpec(memory_space=vmem),   # b2       (F_out, 1)
        ],
        out_specs=pl.BlockSpec(memory_space=vmem),
    )(adjT_blk, xT, w1T, b1c, w2T, b2c)

    # Layout plumbing back to the module's (T, N, F_out) output.
    out = outT.T.reshape(T, N, F_out)

    # TODO(synk): use_temporal branch (data-dependent temporal_graph_fn graph
    # construction per node) not implemented; default STGI config is
    # use_spatial=True, use_temporal=False.
    temporal_graph_time = 0.0
    return out, temporal_graph_time


# -----------------------------------------------------------------------------
# Glue: normalized adjacency A_hat = D^{-1/2}(A + I)D^{-1/2} (GCNConv norm)
# -----------------------------------------------------------------------------
def gcn_normalize(edge_index, edge_weight, num_nodes):
    src, dst = edge_index[0], edge_index[1]
    A = jnp.zeros((num_nodes, num_nodes), jnp.float32)
    A = A.at[dst, src].add(edge_weight)               # A[i, j] = w(j -> i)
    A = A + jnp.eye(num_nodes, dtype=jnp.float32)     # self-loops (weight 1)
    deg = A.sum(axis=1)
    dinv = jnp.where(deg > 0, 1.0 / jnp.sqrt(deg), 0.0)
    return dinv[:, None] * A * dinv[None, :]


def glorot(key, shape):
    fan_in, fan_out = shape
    limit = jnp.sqrt(6.0 / (fan_in + fan_out))
    return jax.random.uniform(key, shape, jnp.float32, -limit, limit)


if __name__ == "__main__":
    # Small shapes consistent with the module's forward:
    # x: (time_steps, num_nodes, feature_dim); hidden_dim=32, num_layers=2.
    T, N, F_IN, HIDDEN = 8, 16, 4, 32
    key = jax.random.PRNGKey(0)
    k_x, k_w1, k_w2, k_ew = jax.random.split(key, 4)

    x = jax.random.normal(k_x, (T, N, F_IN), jnp.float32)
    mask = jnp.zeros((T, N, F_IN), jnp.bool_)

    # Deterministic bidirectional ring graph with random positive weights.
    src = jnp.arange(N, dtype=jnp.int32)
    dst = (src + 1) % N
    spatial_edge_index = jnp.stack(
        [jnp.concatenate([src, dst]), jnp.concatenate([dst, src])], axis=0)
    spatial_edge_weight = jax.random.uniform(
        k_ew, (2 * N,), jnp.float32, 0.5, 1.5)

    adj_hat = gcn_normalize(spatial_edge_index, spatial_edge_weight, N)

    # GCNConv parameters (num_layers=2): in->hidden, hidden->in (out_dim=in_dim)
    w1 = glorot(k_w1, (F_IN, HIDDEN))
    b1 = jnp.zeros((1, HIDDEN), jnp.float32)
    w2 = glorot(k_w2, (HIDDEN, F_IN))
    b2 = jnp.zeros((1, F_IN), jnp.float32)

    # Static-graph preprocessing (hoistable out of the per-call path).
    adjT_blk, w1T, b1c, w2T, b2c = build_stgi_operands(
        adj_hat, w1, b1, w2, b2, T)

    out, tg_time = stgi_forward(x, mask, adjT_blk, w1T, b1c, w2T, b2c)
    out = jax.block_until_ready(out)

    # Pure-JAX reference of the same math (original GCNConv association).
    h_ref = jnp.maximum(
        jnp.einsum("ij,tjh->tih", adj_hat, x @ w1) + b1[None], 0.0)
    ref = jnp.tanh(jnp.einsum("ij,tjh->tih", adj_hat, h_ref @ w2) + b2[None])

    assert out.shape == (T, N, F_IN)
    assert not bool(jnp.isnan(out).any()), "NaNs in model output"
    assert jnp.allclose(out, ref, atol=1e-5, rtol=1e-5), "mismatch vs reference"

    print("KERNEL_OK")
</pallas_src>

<mosaic_0001>
module attributes {stable_mosaic.version = 11 : i64} {
  func.func @stgi_spatial_kernel(%arg0: memref<128x128xf32, #tpu.memory_space<vmem>>, %arg1: memref<4x128xf32, #tpu.memory_space<vmem>>, %arg2: memref<32x4xf32, #tpu.memory_space<vmem>>, %arg3: memref<32x1xf32, #tpu.memory_space<vmem>>, %arg4: memref<4x32xf32, #tpu.memory_space<vmem>>, %arg5: memref<4x1xf32, #tpu.memory_space<vmem>>, %arg6: memref<4x128xf32, #tpu.memory_space<vmem>>) attributes {dimension_semantics = [], scalar_prefetch = 0 : i64, scratch_operands = 0 : i64, tpu.core_type = #tpu.core_type<tc>} {
    %c0 = arith.constant 0 : index
    %c0_0 = arith.constant 0 : index
    %0 = vector.load %arg0[%c0, %c0_0] : memref<128x128xf32, #tpu.memory_space<vmem>>, vector<128x128xf32>
    %c0_1 = arith.constant 0 : index
    %c0_2 = arith.constant 0 : index
    %1 = vector.load %arg1[%c0_1, %c0_2] : memref<4x128xf32, #tpu.memory_space<vmem>>, vector<4x128xf32>
    %cst = arith.constant dense<0.000000e+00> : vector<4x128xf32>
    %2 = tpu.matmul %1, %0, %cst {dimension_numbers = #tpu.dot_dimension_numbers<[1], [0], [0], [1], [0, 0, 1, 1], [], []>} : vector<4x128xf32>, vector<128x128xf32>, vector<4x128xf32> -> vector<4x128xf32>
    %c0_3 = arith.constant 0 : index
    %c0_4 = arith.constant 0 : index
    %3 = vector.load %arg2[%c0_3, %c0_4] : memref<32x4xf32, #tpu.memory_space<vmem>>, vector<32x4xf32>
    %cst_5 = arith.constant dense<0.000000e+00> : vector<32x128xf32>
    %4 = tpu.matmul %3, %2, %cst_5 {dimension_numbers = #tpu.dot_dimension_numbers<[1], [0], [0], [1], [0, 0, 1, 1], [], []>} : vector<32x4xf32>, vector<4x128xf32>, vector<32x128xf32> -> vector<32x128xf32>
    %c0_6 = arith.constant 0 : index
    %c0_7 = arith.constant 0 : index
    %5 = vector.load %arg3[%c0_6, %c0_7] : memref<32x1xf32, #tpu.memory_space<vmem>>, vector<32x1xf32>
    %6 = vector.broadcast %5 : vector<32x1xf32> to vector<32x128xf32>
    %7 = arith.addf %4, %6 : vector<32x128xf32>
    %cst_8 = arith.constant 0.000000e+00 : f32
    %8 = vector.broadcast %cst_8 : f32 to vector<32x128xf32>
    %9 = arith.maximumf %7, %8 : vector<32x128xf32>
    %c0_9 = arith.constant 0 : index
    %c0_10 = arith.constant 0 : index
    %10 = vector.load %arg4[%c0_9, %c0_10] : memref<4x32xf32, #tpu.memory_space<vmem>>, vector<4x32xf32>
    %cst_11 = arith.constant dense<0.000000e+00> : vector<4x128xf32>
    %11 = tpu.matmul %10, %9, %cst_11 {dimension_numbers = #tpu.dot_dimension_numbers<[1], [0], [0], [1], [0, 0, 1, 1], [], []>} : vector<4x32xf32>, vector<32x128xf32>, vector<4x128xf32> -> vector<4x128xf32>
    %cst_12 = arith.constant dense<0.000000e+00> : vector<4x128xf32>
    %12 = tpu.matmul %11, %0, %cst_12 {dimension_numbers = #tpu.dot_dimension_numbers<[1], [0], [0], [1], [0, 0, 1, 1], [], []>} : vector<4x128xf32>, vector<128x128xf32>, vector<4x128xf32> -> vector<4x128xf32>
    %c0_13 = arith.constant 0 : index
    %c0_14 = arith.constant 0 : index
    %13 = vector.load %arg5[%c0_13, %c0_14] : memref<4x1xf32, #tpu.memory_space<vmem>>, vector<4x1xf32>
    %14 = vector.broadcast %13 : vector<4x1xf32> to vector<4x128xf32>
    %15 = arith.addf %12, %14 : vector<4x128xf32>
    %16 = math.tanh %15 : vector<4x128xf32>
    %c0_15 = arith.constant 0 : index
    %c0_16 = arith.constant 0 : index
    %17 = vector.load %arg6[%c0_15, %c0_16] : memref<4x128xf32, #tpu.memory_space<vmem>>, vector<4x128xf32>
    tpu.vector_store %arg6[%c0_15, %c0_16], %16 {strides = array<i32>} : memref<4x128xf32, #tpu.memory_space<vmem>>, vector<4x128xf32>,
    return
  }
}

</mosaic_0001>

<bundles_post_ra>
// kernel: tpu_custom_call.1
= control target key start
LH: loop header
LB: loop body
LE: loop exit
PB: predicated region body
PF: predicated region fallthrough
CT: control target
= control target key end

     0   :  { %11 = vsyncpa [#allocation3], 0  ;;  %s812_s0 = inlined_call_operand.hbm [shape: f32[128,128], index: 0, kind: input, shape index: {}]   ;;  %s813_s1 = inlined_call_operand.vmem [shape: f32[4,128], index: 1, kind: input, shape index: {}]   ;;  %s814_s2 = inlined_call_operand.vmem [shape: f32[32,4], index: 2, kind: input, shape index: {}]   ;;  %s815_s3 = inlined_call_operand.vmem [shape: f32[32,1], index: 3, kind: input, shape index: {}]   ;;  %s816_s4 = inlined_call_operand.vmem [shape: f32[4,32], index: 4, kind: input, shape index: {}]   ;;  %s817_s5 = inlined_call_operand.vmem [shape: f32[4,1], index: 5, kind: input, shape index: {}]   ;;  %s818_s6 = inlined_call_operand.hbm [shape: f32[4,128], index: 6, kind: output, shape index: {}]  }
   0x1   :  { %12 = vsyncpa [#allocation4], 0  ;;  %s621_s21 = smov [#allocation2]  }
   0x2   :  { %s18_s22 = sshll.u32 %s621_s21, 4  ;;  %s19_s22 = int_to_ptr.vmem [resolvable:$true] %s18_s22 }
   0x3   :  { %s585_s23 = scalar_lea.vmem %s19_s22, 2048  ;;  %p590_p1 = scmp.lt.s32.totalorder %s19_s22, %s19_s22 }
   0x4   :  { %p586_p0 = scmp.ne.s32.totalorder %s19_s22, %s585_s23  ;;  %p591_p2 = scmp.lt.s32.totalorder %s585_s23, %s585_s23 }
   0x6   :  { %p592_p3 = por %p591_p2, %p590_p1 }
   0x8   :  { %p593_p4 = pnand %p592_p3, %p586_p0 }
   0xa   :  { %596 = shalt.err (!%p593_p4)
}
   0xb   :  { %s622_s24 = smov 128   ;;  %s623_s25 = smov 8  }
   0xc   :  { %24 = dma.hbm_to_vmem [thread:$0]  %s812_s0, 2048, %s19_s22, [#allocation3], %s622_s24, %s622_s24, %s623_s25  }
   0xd   :  { %617 = dma.done.wait [#allocation3], 2048  }
   0xe   :  { %618 = vsyncadd [#allocation3], 4294965248  ;;  %v624_v0 = vmov 0.0   ;;  %vm625_vm0 = vmmov 0   ;;  %v672_v1 = vld [vmem:[#allocation2 + $0x78] sm:$0xff]  ;;  %v674_v2 = vld [vmem:[#allocation2 + $0x70] sm:$0xff] }
   0xf   :  { %477 = vmatprep.subr.mxu0 %v624_v0  ;;  %509 = vmatprep.mubr.msk.f32.mxu0 %vm625_vm0, %v624_v0  ;;  %v678_v3 = vld [vmem:[#allocation2 + $0x68] sm:$0xff]  ;;  %v682_v4 = vld [vmem:[#allocation2 + $0x60] sm:$0xff]  ;;  %v686_v5 = vld [vmem:[#allocation2 + $0x58] sm:$0xff]  ;;  %vm153_vm1 = vcmask 31744   ;;  %v626_v21 = vmov 0   ;;  %vm166_vm2 = vcmask 1043456  }
  0x10   :  { %520 = vmatprep.subr.mxu1 %v624_v0  ;;  %528 = vmatprep.mubr.msk.f32.mxu1 %vm625_vm0, %v624_v0  ;;  %v690_v6 = vld [vmem:[#allocation2 + $0x50] sm:$0xff]  ;;  %v694_v7 = vld [vmem:[#allocation2 + $0x48] sm:$0xff]  ;;  %v698_v8 = vld [vmem:[#allocation2 + $0x40] sm:$0xff]  ;;  %vm260_vm3 = vcmask 261120  }
  0x11   :  { %478 = vmatpush3.msra.mxu0 %v672_v1  ;;  %v702_v9 = vld [vmem:[#allocation2 + $0x38] sm:$0xff]  ;;  %v706_v10 = vld [vmem:[#allocation2 + $0x30] sm:$0xff]  ;;  %v710_v11 = vld [vmem:[#allocation2 + $0x28] sm:$0xff]  ;;  %573 = vset.pattern.permute.xlu0 %v626_v21 }
  0x12   :  { %479 = vmatprep.subr.mxu0 %v624_v0  ;;  %v714_v12 = vld [vmem:[#allocation2 + $0x20] sm:$0xff]  ;;  %v718_v13 = vld [vmem:[#allocation2 + $0x18] sm:$0xff]  ;;  %v722_v14 = vld [vmem:[#allocation2 + $0x10] sm:$0xff]  ;;  %574 = vset.pattern.permute.xlu1 %v626_v21 }
  0x13   :  { %480 = vmatpush3.msra.mxu0 %v674_v2  ;;  %v726_v15 = vld [vmem:[#allocation2 + $0x8] sm:$0xff]  ;;  %v730_v16 = vld [vmem:[#allocation2] sm:$0xff]  ;;  %v132_v19 = vld [vmem:[%s815_s3 + $0x18] sm:$0xff] }
  0x14   :  { %481 = vmatprep.subr.mxu0 %v624_v0  ;;  %v54_v17 = vld [vmem:[%s813_s1] sm:$0xf]  ;;  %v130_v20 = vld [vmem:[%s815_s3 + $0x8] sm:$0xff]  ;;  %150 = vperm.xlu0 %573, %v132_v19   ;;  %v131_v22 = vld [vmem:[%s815_s3 + $0x10] sm:$0xff] }
  0x15   :  { %482 = vmatpush3.msra.mxu0 %v678_v3  ;;  %v125_v18 = vld [vmem:[%s814_s2] sm:$0xff]  ;;  %140 = vperm.xlu1 %574, %v130_v20   ;;  %v126_v26 = vld [vmem:[%s814_s2 + $0x8] sm:$0xff]  ;;  %v127_v27 = vld [vmem:[%s814_s2 + $0x10] sm:$0xff] }
  0x16   :  { %483 = vmatprep.subr.mxu0 %v624_v0  ;;  %v129_v23 = vld [vmem:[%s815_s3] sm:$0xff]  ;;  %v128_v29 = vld [vmem:[%s814_s2 + $0x18] sm:$0xff] }
  0x17   :  { %484 = vmatpush3.msra.mxu0 %v682_v4  ;;  %v334_v24 = vld [vmem:[%s817_s5] sm:$0xf] }
  0x18   :  { %485 = vmatprep.subr.mxu0 %v624_v0  ;;  %145 = vperm.xlu0 %573, %v131_v22   ;;  %v259_v46 = vld [vmem:[%s816_s4] sm:$0xf]  ;;  %s627_s4 = smov [#allocation5]  }
  0x19   :  { %486 = vmatpush3.msra.mxu0 %v686_v5  ;;  %135 = vperm.xlu1 %574, %v129_v23   ;;  %s418_s21 = sshll.u32 %s627_s4, 4  ;;  %s419_s21 = int_to_ptr.vmem [resolvable:$true] %s418_s21 }
  0x1a   :  { %487 = vmatprep.subr.mxu0 %v624_v0  ;;  %s597_s22 = scalar_lea.vmem %s419_s21, 64  ;;  %p602_p6 = scmp.lt.s32.totalorder %s419_s21, %s419_s21 }
  0x1b   :  { %488 = vmatpush3.msra.mxu0 %v690_v6  ;;  %p598_p5 = scmp.ne.s32.totalorder %s419_s21, %s597_s22  ;;  %p603_p7 = scmp.lt.s32.totalorder %s597_s22, %s597_s22 }
  0x1c   :  { %489 = vmatprep.subr.mxu0 %v624_v0  ;;  %337 = vperm.xlu0 %573, %v334_v24  }
  0x1d   :  { %490 = vmatpush3.msra.mxu0 %v694_v7  ;;  %p604_p8 = por %p603_p7, %p602_p6 }
  0x1e   :  { %491 = vmatprep.subr.mxu0 %v624_v0 }
  0x1f   :  { %492 = vmatpush3.msra.mxu0 %v698_v8  ;;  %p605_p9 = pnand %p604_p8, %p598_p5 }
  0x20   :  { %493 = vmatprep.subr.mxu0 %v624_v0 }
  0x21   :  { %494 = vmatpush3.msra.mxu0 %v702_v9 }
  0x22   :  { %495 = vmatprep.subr.mxu0 %v624_v0 }
  0x23   :  { %496 = vmatpush3.msra.mxu0 %v706_v10 }
  0x24   :  { %497 = vmatprep.subr.mxu0 %v624_v0 }
  0x25   :  { %498 = vmatpush3.msra.mxu0 %v710_v11 }
  0x26   :  { %499 = vmatprep.subr.mxu0 %v624_v0 }
  0x27   :  { %500 = vmatpush3.msra.mxu0 %v714_v12 }
  0x28   :  { %501 = vmatprep.subr.mxu0 %v624_v0 }
  0x29   :  { %502 = vmatpush3.msra.mxu0 %v718_v13 }
  0x2a   :  { %503 = vmatprep.subr.mxu0 %v624_v0 }
  0x2b   :  { %504 = vmatpush3.msra.mxu0 %v722_v14 }
  0x2c   :  { %505 = vmatprep.subr.mxu0 %v624_v0 }
  0x2d   :  { %506 = vmatpush3.msra.mxu0 %v726_v15 }
  0x2e   :  { %507 = vmatprep.subr.mxu0 %v624_v0 }
  0x2f   :  { %508 = vmatpush3.msra.mxu0 %v730_v16 }
  0x30   :  { %510 = vmatmul.mubr.f32.vlgmr.msra.gmra.mxu0 %v54_v17 }
  0x31   :  { %514 = vmatprep.mubr.msk.f32.mxu0 %vm153_vm1, %v125_v18 }
  0x8f   :  { %v151_v30 = vpop.permute.xlu0 %150 }
  0x90   :  { %v141_v31 = vpop.permute.xlu1 %140 }
  0x93   :  { %v146_v35 = vpop.permute.xlu0 %145 }
  0x94   :  { %v136_v37 = vpop.permute.xlu1 %135 }
  0x97   :  { %v338_v49 = vpop.permute.xlu0 %337 }
  0xf0   :  { %v121_v25 = vpop.f32.mrf.mxu0 }
  0xf1   :  { %512 = vmatprep.subr.msk.mxu0 %vm166_vm2, %v121_v25 }
  0xf2   :  { %v511_v28 = vpop.f32.mrf.mxu0  ;;  %513 = vmatpush3.msk.msra.mxu0 %vm166_vm2, %v121_v25 }
  0xf3   :  { %515 = vmatmul.mubr.msk.f32.vlgmr.msra.gmra.mxu0 %vm153_vm1, %v126_v26 }
  0xf4   :  { %517 = vmatprep.mubr.msk.f32.mxu0 %vm153_vm1, %v127_v27 }
  0xf7   :  { %518 = vmatmul.mubr.msk.f32.gmra.mxu0 %vm153_vm1, %v128_v29 }
 0x1b3   :  { %v516_v32 = vpop.f32.mrf.mxu0 }
 0x1b4   :  { %v242_v39 = vadd.f32 %v516_v32, %v141_v31 }
 0x1b5   :  { %v236_v33 = vpop.f32.mrf.mxu0 }
 0x1b6   :  { %v237_v42 = vadd.f32 %v236_v33, %v136_v37  ;;  %v256_v44 = vmax.f32 %v242_v39, 0.0 }
 0x1b7   :  { %v519_v34 = vpop.f32.mrf.mxu0 }
 0x1b8   :  { %v252_v36 = vadd.f32 %v519_v34, %v151_v30  ;;  %v255_v45 = vmax.f32 %v237_v42, 0.0 }
 0x1b9   :  { %v246_v38 = vpop.f32.mrf.mxu0 }
 0x1ba   :  { %v258_v40 = vmax.f32 %v252_v36, 0.0  ;;  %v247_v41 = vadd.f32 %v246_v38, %v146_v35 }
 0x1bc   :  { %v257_v43 = vmax.f32 %v247_v41, 0.0  ;;  %521 = vmatpush3.msra.mxu1 %v258_v40 }
 0x1bd   :  { %522 = vmatprep.subr.mxu1 %v624_v0 }
 0x1be   :  { %523 = vmatpush3.msra.mxu1 %v257_v43 }
 0x1bf   :  { %524 = vmatprep.subr.mxu1 %v624_v0 }
 0x1c0   :  { %525 = vmatpush3.msra.mxu1 %v256_v44 }
 0x1c1   :  { %526 = vmatprep.subr.mxu1 %v624_v0 }
 0x1c2   :  { %527 = vmatpush3.msra.mxu1 %v255_v45 }
 0x1c3   :  { %529 = vmatmul.mubr.msk.f32.vlgmr.msra.gmra.mxu1 %vm260_vm3, %v259_v46  ;;  %531 = vmatprep.subr.mxu1 %v624_v0 }
 0x1c4   :  { %532 = vmatpush3.msra.mxu1 %v672_v1  ;;  %563 = vmatprep.mubr.msk.f32.mxu1 %vm625_vm0, %v624_v0 }
 0x1c5   :  { %533 = vmatprep.subr.mxu1 %v624_v0 }
 0x1c6   :  { %534 = vmatpush3.msra.mxu1 %v674_v2 }
 0x1c7   :  { %535 = vmatprep.subr.mxu1 %v624_v0 }
 0x1c8   :  { %536 = vmatpush3.msra.mxu1 %v678_v3 }
 0x1c9   :  { %537 = vmatprep.subr.mxu1 %v624_v0 }
 0x1ca   :  { %538 = vmatpush3.msra.mxu1 %v682_v4 }
 0x1cb   :  { %539 = vmatprep.subr.mxu1 %v624_v0 }
 0x1cc   :  { %540 = vmatpush3.msra.mxu1 %v686_v5 }
 0x1cd   :  { %541 = vmatprep.subr.mxu1 %v624_v0 }
 0x1ce   :  { %542 = vmatpush3.msra.mxu1 %v690_v6 }
 0x1cf   :  { %543 = vmatprep.subr.mxu1 %v624_v0 }
 0x1d0   :  { %544 = vmatpush3.msra.mxu1 %v694_v7 }
 0x1d1   :  { %545 = vmatprep.subr.mxu1 %v624_v0 }
 0x1d2   :  { %546 = vmatpush3.msra.mxu1 %v698_v8 }
 0x1d3   :  { %547 = vmatprep.subr.mxu1 %v624_v0 }
 0x1d4   :  { %548 = vmatpush3.msra.mxu1 %v702_v9 }
 0x1d5   :  { %549 = vmatprep.subr.mxu1 %v624_v0 }
 0x1d6   :  { %550 = vmatpush3.msra.mxu1 %v706_v10 }
 0x1d7   :  { %551 = vmatprep.subr.mxu1 %v624_v0 }
 0x1d8   :  { %552 = vmatpush3.msra.mxu1 %v710_v11 }
 0x1d9   :  { %553 = vmatprep.subr.mxu1 %v624_v0 }
 0x1da   :  { %554 = vmatpush3.msra.mxu1 %v714_v12 }
 0x1db   :  { %555 = vmatprep.subr.mxu1 %v624_v0 }
 0x1dc   :  { %556 = vmatpush3.msra.mxu1 %v718_v13 }
 0x1dd   :  { %557 = vmatprep.subr.mxu1 %v624_v0 }
 0x1de   :  { %558 = vmatpush3.msra.mxu1 %v722_v14 }
 0x1df   :  { %559 = vmatprep.subr.mxu1 %v624_v0 }
 0x1e0   :  { %560 = vmatpush3.msra.mxu1 %v726_v15 }
 0x1e1   :  { %561 = vmatprep.subr.mxu1 %v624_v0 }
 0x1e2   :  { %562 = vmatpush3.msra.mxu1 %v730_v16 }
 0x283   :  { %v330_v47 = vpop.f32.mrf.mxu1 }
 0x284   :  { %564 = vmatmul.mubr.f32.vlgmr.msra.gmra.mxu1 %v330_v47 }
 0x285   :  { %v530_v48 = vpop.f32.mrf.mxu1 }
 0x344   :  { %v406_v50 = vpop.f32.mrf.mxu1 }
 0x345   :  { %v407_v51 = vadd.f32 %v406_v50, %v338_v49 }
 0x346   :  { %v565_v52 = vpop.f32.mrf.mxu1 }
 0x347   :  { %575 = vtanh.f32 %v407_v51 }
 0x354   :  { %v576_v53 = vpop.eup %575 }
 0x355   :  { %411 = vst [vmem:[#allocation5] sm:$0xf] %v576_v53 }
 0x356   :  { %608 = shalt.err (!%p605_p9)
}
 0x357   :  { %421 = dma.vmem_to_hbm [thread:$0]  %s419_s21, 64, %s818_s6, [#allocation4]  }
 0x358   :  { %619 = dma.done.wait [#allocation4], 64  }
 0x359   :  { %620 = vsyncadd [#allocation4], 4294967232 }
 0x35a   :  { %425 = vsyncpa [#allocation3], 1 }
 0x35b   :  { %426 = vsyncpa [#allocation4], 1 }

</bundles_post_ra>
